<compile_context>
chip_gen: v6e
topology: v6e:2x2x1
jax: 0.10.0
libtpu: 0.0.40
codegen_flags: <defaults>
</compile_context>

<pallas_src>
import functools

import jax
import jax.numpy as jnp
from jax.experimental import pallas as pl
from jax.experimental.pallas import tpu as pltpu

_LANE = 128
_TARGET_BLOCK_BYTES = 2 * 1024 * 1024   # per-input block; 2 in x 2 bufs = 8 MiB VMEM


def _round_up(x, m):
    return (x + m - 1) // m * m


def _mse_kernel(pred_ref, tgt_ref, psum_ref, *, rows, block_rows,
                blocks_per_p, mask_tail):
    k = pl.program_id(1)

    @pl.when(k == 0)
    def _init():
        psum_ref[...] = jnp.zeros_like(psum_ref)

    # Cast to f32 inside the kernel (keeps HBM traffic at the native dtype).
    d = pred_ref[...].astype(jnp.float32) - tgt_ref[...].astype(jnp.float32)
    sq = d * d

    def _fold(vals):
        # (block_rows, 128) -> (8, 128): pure elementwise vreg adds (VPU).
        return vals.reshape(block_rows // 8, 8, _LANE).sum(axis=0)[None]

    if not mask_tail:
        psum_ref[...] += _fold(sq)
    else:
        # Only the step(s) whose block overshoots the real rows pay for the
        # iota + compare + select; all full blocks take the cheap path.
        start = (pl.program_id(0) * blocks_per_p + k) * block_rows
        is_partial = start + block_rows > rows

        @pl.when(start + block_rows <= rows)
        def _full():
            psum_ref[...] += _fold(sq)

        @pl.when(is_partial)
        def _tail():
            row_idx = jax.lax.broadcasted_iota(jnp.int32, sq.shape, 0) + start
            psum_ref[...] += _fold(jnp.where(row_idx < rows, sq, 0.0))


def custom_mse_loss(predicted, target):
    """Pallas equivalent of torch.mean((predicted - target) ** 2)."""
    assert predicted.shape == target.shape
    n = int(predicted.size)
    assert n > 0

    p = predicted.reshape(-1)
    t = target.reshape(-1)

    rows = n // _LANE
    rem = n - rows * _LANE

    # Tiny inputs: kernel launch overhead dominates; just do it in XLA.
    if rows < 8:
        d = p.astype(jnp.float32) - t.astype(jnp.float32)
        return jnp.sum(d * d) / n

    n_main = rows * _LANE
    if rem:
        # TODO(synk): when n % 128 != 0 the prefix slice materializes one copy
        # of the main body (a truly zero-copy path would need a manual-DMA 1-D
        # kernel); the <=127-element remainder itself is summed in plain JAX.
        p_main, t_main = p[:n_main], t[:n_main]
    else:
        p_main, t_main = p, t

    p2 = p_main.reshape(rows, _LANE)
    t2 = t_main.reshape(rows, _LANE)

    # Block sizing by bytes (~2 MiB per input), rounded to the dtype's sublane
    # multiple and clamped to the (sublane-rounded) row count.
    itemsize = max(p2.dtype.itemsize, t2.dtype.itemsize)
    sublane = max(8, 32 // itemsize)          # 8 for f32, 16 for bf16, 32 for i8
    block_rows = (_TARGET_BLOCK_BYTES // (_LANE * itemsize)) // sublane * sublane
    block_rows = max(sublane, min(block_rows, _round_up(rows, sublane)))

    num_blocks = pl.cdiv(rows, block_rows)

    # Leading axis shards blocks across TensorCores on multi-core chips (v7x).
    # Keep it 1 whenever splitting would add a phantom (clamped + masked) tail
    # block that is a noticeable fraction of the stream, since on 1-TC chips
    # (v5e/v6e) that block is pure wasted DMA.
    n_par = 2 if num_blocks >= 2 and (num_blocks % 2 == 0 or num_blocks >= 8) else 1
    blocks_per_p = pl.cdiv(num_blocks, n_par)

    # Mask needed whenever the (n_par, K) grid over-covers the real rows.
    mask_tail = (n_par * blocks_per_p * block_rows) != rows

    if n_par * blocks_per_p == num_blocks:
        def in_map(pi, ki):
            return (pi * blocks_per_p + ki, 0)
    else:
        last_block = num_blocks - 1

        def in_map(pi, ki):
            # Clamp phantom tail blocks to the last real block (their
            # contribution is masked to zero in-kernel anyway).
            return (jnp.minimum(pi * blocks_per_p + ki, last_block), 0)

    kernel = functools.partial(
        _mse_kernel,
        rows=rows,
        block_rows=block_rows,
        blocks_per_p=blocks_per_p,
        mask_tail=mask_tail,
    )

    cost = pl.CostEstimate(
        flops=3 * n_main,          # sub + mul + add per element
        transcendentals=0,
        bytes_accessed=n_main * (p2.dtype.itemsize + t2.dtype.itemsize)
        + n_par * 8 * _LANE * 4,
    )

    partial_sums = pl.pallas_call(
        kernel,
        out_shape=jax.ShapeDtypeStruct((n_par, 8, _LANE), jnp.float32),
        grid_spec=pltpu.PrefetchScalarGridSpec(
            num_scalar_prefetch=0,
            grid=(n_par, blocks_per_p),
            in_specs=[
                pl.BlockSpec((block_rows, _LANE), in_map),
                pl.BlockSpec((block_rows, _LANE), in_map),
            ],
            out_specs=pl.BlockSpec((1, 8, _LANE), lambda pi, ki: (pi, 0, 0)),
            scratch_shapes=[],
        ),
        compiler_params=pltpu.CompilerParams(
            dimension_semantics=("parallel", "arbitrary"),
        ),
        cost_estimate=cost,
    )(p2, t2)

    # Single tiny cross-lane reduce, plus the <=127-element remainder in XLA.
    total = jnp.sum(partial_sums)
    if rem:
        dr = p[n_main:].astype(jnp.float32) - t[n_main:].astype(jnp.float32)
        total = total + jnp.sum(dr * dr)
    return total / n


if __name__ == "__main__":
    key = jax.random.PRNGKey(0)
    k1, k2, k3, k4, k5, k6 = jax.random.split(key, 6)

    # Primary case: NCHW, matching typical PyTorch inputs for this loss.
    predicted = jax.random.normal(k1, (2, 4, 16, 16), dtype=jnp.float32)
    target = jax.random.normal(k2, (2, 4, 16, 16), dtype=jnp.float32)
    loss = jax.block_until_ready(custom_mse_loss(predicted, target))
    ref = jnp.mean((predicted - target) ** 2)
    assert jnp.allclose(loss, ref, rtol=1e-5, atol=1e-6), (loss, ref)

    # n % 128 != 0: exercises the plain-JAX remainder path (no padding copy).
    p2_ = jax.random.normal(k3, (3, 343), dtype=jnp.float32)
    t2_ = jax.random.normal(k4, (3, 343), dtype=jnp.float32)
    loss2 = jax.block_until_ready(custom_mse_loss(p2_, t2_))
    ref2 = jnp.mean((p2_ - t2_) ** 2)
    assert jnp.allclose(loss2, ref2, rtol=1e-5, atol=1e-6), (loss2, ref2)

    # rows not a multiple of the block: exercises the pl.when-gated tail mask.
    p3_ = jax.random.normal(k5, (9, 131), dtype=jnp.float32)
    t3_ = jax.random.normal(k6, (9, 131), dtype=jnp.float32)
    loss3 = jax.block_until_ready(custom_mse_loss(p3_, t3_))
    ref3 = jnp.mean((p3_ - t3_) ** 2)
    assert jnp.allclose(loss3, ref3, rtol=1e-5, atol=1e-6), (loss3, ref3)

    print("KERNEL_OK")
</pallas_src>

<mosaic_0001>
module attributes {stable_mosaic.version = 11 : i64} {
  func.func @_mse_kernel(%arg0: i32, %arg1: i32, %arg2: memref<16x128xf32, #tpu.memory_space<vmem>>, %arg3: memref<16x128xf32, #tpu.memory_space<vmem>>, %arg4: memref<1x8x128xf32, #tpu.memory_space<vmem>>) attributes {dimension_semantics = [#tpu.dimension_semantics<parallel>, #tpu.dimension_semantics<arbitrary>], iteration_bounds = array<i64: 1, 1>, scalar_prefetch = 0 : i64, scratch_operands = 0 : i64, tpu.core_type = #tpu.core_type<tc>, window_params = [{transform_indices = @transform_0, window_bounds = array<i64: 16, 128>}, {transform_indices = @transform_1, window_bounds = array<i64: 16, 128>}, {transform_indices = @transform_2, window_bounds = array<i64: 1, 8, 128>}]} {
    %c0_i32 = arith.constant 0 : i32
    %0 = arith.cmpi eq, %arg1, %c0_i32 : i32
    %1 = arith.extui %0 : i1 to i32
    %c0_i32_0 = arith.constant 0 : i32
    %2 = arith.cmpi ne, %1, %c0_i32_0 : i32
    scf.if %2 {
      %cst_10 = arith.constant 0.000000e+00 : f32
      %13 = vector.broadcast %cst_10 : f32 to vector<1x8x128xf32>
      %c0_11 = arith.constant 0 : index
      %c0_12 = arith.constant 0 : index
      %c0_13 = arith.constant 0 : index
      %14 = vector.load %arg4[%c0_11, %c0_12, %c0_13] : memref<1x8x128xf32, #tpu.memory_space<vmem>>, vector<1x8x128xf32>
      tpu.vector_store %arg4[%c0_11, %c0_12, %c0_13], %13 {strides = array<i32>} : memref<1x8x128xf32, #tpu.memory_space<vmem>>, vector<1x8x128xf32>,
    } else {
    }
    %c0 = arith.constant 0 : index
    %c0_1 = arith.constant 0 : index
    %3 = vector.load %arg2[%c0, %c0_1] : memref<16x128xf32, #tpu.memory_space<vmem>>, vector<16x128xf32>
    %c0_2 = arith.constant 0 : index
    %c0_3 = arith.constant 0 : index
    %4 = vector.load %arg3[%c0_2, %c0_3] : memref<16x128xf32, #tpu.memory_space<vmem>>, vector<16x128xf32>
    %5 = arith.subf %3, %4 : vector<16x128xf32>
    %6 = arith.mulf %5, %5 : vector<16x128xf32>
    %c0_4 = arith.constant 0 : index
    %c0_5 = arith.constant 0 : index
    %c0_6 = arith.constant 0 : index
    %7 = vector.load %arg4[%c0_4, %c0_5, %c0_6] : memref<1x8x128xf32, #tpu.memory_space<vmem>>, vector<1x8x128xf32>
    %8 = vector.shape_cast %6 : vector<16x128xf32> to vector<2x8x128xf32>
    %cst = arith.constant dense<0.000000e+00> : vector<8x128xf32>
    %9 = vector.multi_reduction <add>, %8, %cst [0] : vector<2x8x128xf32> to vector<8x128xf32>
    %10 = vector.shape_cast %9 : vector<8x128xf32> to vector<1x8x128xf32>
    %11 = arith.addf %7, %10 : vector<1x8x128xf32>
    %c0_7 = arith.constant 0 : index
    %c0_8 = arith.constant 0 : index
    %c0_9 = arith.constant 0 : index
    %12 = vector.load %arg4[%c0_7, %c0_8, %c0_9] : memref<1x8x128xf32, #tpu.memory_space<vmem>>, vector<1x8x128xf32>
    tpu.vector_store %arg4[%c0_7, %c0_8, %c0_9], %11 {strides = array<i32>} : memref<1x8x128xf32, #tpu.memory_space<vmem>>, vector<1x8x128xf32>,
    return
  }
  func.func @transform_0(%arg0: i32, %arg1: i32) -> (i32, i32) {
    %c1_i32 = arith.constant 1 : i32
    %0 = arith.muli %arg0, %c1_i32 : i32
    %1 = arith.addi %0, %arg1 : i32
    %c0_i32 = arith.constant 0 : i32
    %c0_i32_0 = arith.constant 0 : i32
    return %1, %c0_i32 : i32, i32
  }
  func.func @transform_1(%arg0: i32, %arg1: i32) -> (i32, i32) {
    %c1_i32 = arith.constant 1 : i32
    %0 = arith.muli %arg0, %c1_i32 : i32
    %1 = arith.addi %0, %arg1 : i32
    %c0_i32 = arith.constant 0 : i32
    %c0_i32_0 = arith.constant 0 : i32
    return %1, %c0_i32 : i32, i32
  }
  func.func @transform_2(%arg0: i32, %arg1: i32) -> (i32, i32, i32) {
    %c0_i32 = arith.constant 0 : i32
    %c0_i32_0 = arith.constant 0 : i32
    %c0_i32_1 = arith.constant 0 : i32
    return %arg0, %c0_i32, %c0_i32_0 : i32, i32, i32
  }
}

</mosaic_0001>

<bundles_post_ra>
// kernel: tpu_custom_call.1
= control target key start
LH: loop header
LB: loop body
LE: loop exit
PB: predicated region body
PF: predicated region fallthrough
CT: control target
= control target key end

     0   :  { %7 = vsyncpa [#allocation3], 0  ;;  %s186_s0 = inlined_call_operand.hbm [shape: f32[16,128], index: 0, kind: input, shape index: {}]   ;;  %s187_s1 = inlined_call_operand.hbm [shape: f32[16,128], index: 1, kind: input, shape index: {}]   ;;  %s188_s2 = inlined_call_operand.hbm [shape: f32[1,8,128], index: 2, kind: output, shape index: {}]  }
   0x1   :  { %8 = vsyncpa [#allocation6], 0 }
   0x2   :  { %9 = vsyncpa [#allocation4], 0  ;;  %s157_s9 = smov [#allocation2]  }
   0x3   :  { %s19_s10 = sshll.u32 %s157_s9, 4  ;;  %s20_s10 = int_to_ptr.vmem [resolvable:$true] %s19_s10 }
   0x4   :  { %s99_s11 = scalar_lea.vmem %s20_s10, 256  ;;  %p104_p1 = scmp.lt.s32.totalorder %s20_s10, %s20_s10 }
   0x5   :  { %p100_p0 = scmp.ne.s32.totalorder %s20_s10, %s99_s11  ;;  %p105_p2 = scmp.lt.s32.totalorder %s99_s11, %s99_s11 }
   0x7   :  { %p106_p3 = por %p105_p2, %p104_p1 }
   0x9   :  { %p107_p4 = pnand %p106_p3, %p100_p0 }
   0xb   :  { %110 = shalt.err (!%p107_p4)
}
   0xc   :  { %s158_s12 = smov 128   ;;  %s159_s13 = smov 8  }
   0xd   :  { %25 = dma.hbm_to_vmem [thread:$0]  %s186_s0, 256, %s20_s10, [#allocation3], %s158_s12, %s158_s12, %s159_s13  }
   0xe   :  { %s160_s16 = smov [#allocation5]  }
   0xf   :  { %s35_s17 = sshll.u32 %s160_s16, 4  ;;  %s36_s17 = int_to_ptr.vmem [resolvable:$true] %s35_s17 }
  0x10   :  { %s119_s18 = scalar_lea.vmem %s36_s17, 256  ;;  %p124_p6 = scmp.lt.s32.totalorder %s36_s17, %s36_s17 }
  0x11   :  { %p120_p5 = scmp.ne.s32.totalorder %s36_s17, %s119_s18  ;;  %p125_p7 = scmp.lt.s32.totalorder %s119_s18, %s119_s18 }
  0x13   :  { %p126_p8 = por %p125_p7, %p124_p6 }
  0x15   :  { %p127_p9 = pnand %p126_p8, %p120_p5 }
  0x17   :  { %130 = shalt.err (!%p127_p9)
}
  0x18   :  { %41 = dma.hbm_to_vmem [thread:$0]  %s187_s1, 256, %s36_s17, [#allocation6], %s158_s12, %s158_s12, %s159_s13  }
  0x19   :  { %151 = dma.done.wait [#allocation3], 256  }
  0x1a   :  { %152 = vsyncadd [#allocation3], 4294967040 }
  0x1b   :  { %153 = dma.done.wait [#allocation6], 256  }
  0x1c   :  { %154 = vsyncadd [#allocation6], 4294967040  ;;  %v57_v0 = vld [vmem:[#allocation2] sm:$0xff]  ;;  %v58_v1 = vld [vmem:[#allocation2 + $0x8] sm:$0xff]  ;;  %s161_s0 = smov [#allocation7]  }
  0x1d   :  { %v59_v2 = vld [vmem:[#allocation5] sm:$0xff]  ;;  %v60_v3 = vld [vmem:[#allocation5 + $0x8] sm:$0xff]  ;;  %s75_s21 = sshll.u32 %s161_s0, 4  ;;  %s76_s21 = int_to_ptr.vmem [resolvable:$true] %s75_s21 }
  0x1e   :  { %v61_v4 = vsub.f32 %v57_v0, %v59_v2  ;;  %v62_v5 = vsub.f32 %v58_v1, %v60_v3  ;;  %s131_s22 = scalar_lea.vmem %s76_s21, 128  ;;  %p136_p11 = scmp.lt.s32.totalorder %s76_s21, %s76_s21 }
  0x1f   :  { %p132_p10 = scmp.ne.s32.totalorder %s76_s21, %s131_s22  ;;  %p137_p12 = scmp.lt.s32.totalorder %s131_s22, %s131_s22 }
  0x20   :  { %v63_v6 = vmul.f32 %v61_v4, %v61_v4  ;;  %v64_v7 = vmul.f32 %v62_v5, %v62_v5 }
  0x21   :  { %p138_p13 = por %p137_p12, %p136_p11 }
  0x22   :  { %v66_v8 = vadd.f32 %v64_v7, %v63_v6 }
  0x23   :  { %p139_p0 = pnand %p138_p13, %p132_p10 }
  0x24   :  { %68 = vst [vmem:[#allocation7] sm:$0xff] %v66_v8 }
  0x25   :  { %142 = shalt.err (!%p139_p0)
}
  0x26   :  { %78 = dma.vmem_to_hbm [thread:$0]  %s76_s21, 128, %s188_s2, [#allocation4]  }
  0x27   :  { %155 = dma.done.wait [#allocation4], 128  }
  0x28   :  { %156 = vsyncadd [#allocation4], 4294967168 }
  0x29   :  { %82 = vsyncpa [#allocation3], 1 }
  0x2a   :  { %83 = vsyncpa [#allocation6], 1 }
  0x2b   :  { %84 = vsyncpa [#allocation4], 1 }

</bundles_post_ra>
